<compile_context>
chip_gen: v7x
topology: tpu7x:2x2x1
jax: 0.10.0
libtpu: 0.0.40
codegen_flags: <defaults>
</compile_context>

<pallas_src>
import math
import jax
import jax.numpy as jnp
from jax import lax
from jax.experimental import pallas as pl
from jax.experimental.pallas import tpu as pltpu


def _round_up(x, m):
    return ((x + m - 1) // m) * m


# ---------------------------------------------------------------------------
# Stage 1: fused projection   S = X @ W_cat
#   X     : (M_pad, Fin)          compute dtype (bf16), batch*nodes folded into M
#   W_cat : (Fin, G*Fp)           G in {1,3}: [W | ew*Wf | ew*Wb], each padded to
#                                 Fp = round_up(Fout, 128) lanes (zeros)
#   S     : (M_pad, G*Fp) float32 lane-dense output
# ---------------------------------------------------------------------------
def _proj_kernel(x_ref, w_ref, o_ref):
    o_ref[...] = jnp.dot(x_ref[...], w_ref[...],
                         preferred_element_type=jnp.float32)


def _fused_projection(x_flat, w_cat, tm):
    m_pad, fin = x_flat.shape
    cols = w_cat.shape[1]
    return pl.pallas_call(
        _proj_kernel,
        out_shape=jax.ShapeDtypeStruct((m_pad, cols), jnp.float32),
        grid_spec=pltpu.PrefetchScalarGridSpec(
            num_scalar_prefetch=0,
            grid=(m_pad // tm,),
            in_specs=[
                pl.BlockSpec((tm, fin), lambda i: (i, 0)),
                pl.BlockSpec((fin, cols), lambda i: (0, 0)),
            ],
            out_specs=pl.BlockSpec((tm, cols), lambda i: (i, 0)),
        ),
        compiler_params=pltpu.CompilerParams(
            dimension_semantics=("parallel",)),
    )(x_flat, w_cat)


# ---------------------------------------------------------------------------
# Stage 2: per-batch, N-tiled adjacency contraction
#   out[b, i_blk] = S_loop[b, i_blk]
#                 + sum_k adj[b, i_blk, k_blk]   @ S_f[b, k_blk]
#                 + sum_k adj[b, k_blk, i_blk]^T @ S_b[b, k_blk]
# ---------------------------------------------------------------------------
def _adj_kernel(adj_f_ref, adj_b_ref, sl_ref, sf_ref, sb_ref, o_ref, acc_ref):
    k = pl.program_id(2)

    @pl.when(k == 0)
    def _():
        acc_ref[...] = sl_ref[0]                      # self-loop term (f32)

    # forward edges: adj[i_blk, k_blk] @ S_f[k_blk]
    acc_ref[...] += jnp.dot(adj_f_ref[0], sf_ref[0],
                            preferred_element_type=jnp.float32)
    # backward edges: transposed contraction folded into dot_general
    # (contract dim 0 of the adj tile with dim 0 of S_b -> no XLU transpose).
    acc_ref[...] += lax.dot_general(
        adj_b_ref[0], sb_ref[0],
        dimension_numbers=(((0,), (0,)), ((), ())),
        preferred_element_type=jnp.float32)

    @pl.when(k == pl.num_programs(2) - 1)
    def _():
        o_ref[0] = acc_ref[...].astype(o_ref.dtype)


def _adj_contraction(adj_c, s_loop, s_f, s_b, tile):
    B, n_pad, _ = adj_c.shape
    fp = s_loop.shape[-1]
    nt = n_pad // tile
    return pl.pallas_call(
        _adj_kernel,
        out_shape=jax.ShapeDtypeStruct((B, n_pad, fp), jnp.float32),
        grid_spec=pltpu.PrefetchScalarGridSpec(
            num_scalar_prefetch=0,
            grid=(B, nt, nt),
            in_specs=[
                # adj window used "as is" (forward term): rows i, cols k
                pl.BlockSpec((1, tile, tile), lambda b, i, k: (b, i, k)),
                # adj window used transposed (backward term): rows k, cols i
                pl.BlockSpec((1, tile, tile), lambda b, i, k: (b, k, i)),
                pl.BlockSpec((1, tile, fp), lambda b, i, k: (b, i, 0)),  # S_loop
                pl.BlockSpec((1, tile, fp), lambda b, i, k: (b, k, 0)),  # S_f
                pl.BlockSpec((1, tile, fp), lambda b, i, k: (b, k, 0)),  # S_b
            ],
            out_specs=pl.BlockSpec((1, tile, fp), lambda b, i, k: (b, i, 0)),
            scratch_shapes=[pltpu.VMEM((tile, fp), jnp.float32)],
        ),
        compiler_params=pltpu.CompilerParams(
            dimension_semantics=("parallel", "parallel", "arbitrary")),
    )(adj_c, adj_c, s_loop, s_f, s_b)


# ---------------------------------------------------------------------------
# Public wrapper (matches LclcGNNLayer.forward semantics)
# ---------------------------------------------------------------------------
def lclc_gnn_layer(x, adj, weight, weight_forward=None, weight_backward=None,
                   edge_weight=0.5, compute_dtype=jnp.bfloat16):
    """x: (B, N, Fin) f32; adj: (B, N, N) f32; weights: (Fin, Fout) f32.
    Returns (B, N, Fout) f32. Matmuls run in `compute_dtype` with f32 accumulation."""
    x = jnp.asarray(x, jnp.float32)
    B, N, fin = x.shape
    fout = weight.shape[1]
    fp = _round_up(fout, 128)            # lane-dense output / intermediate width

    if edge_weight != 0:
        assert weight_forward is not None and weight_backward is not None, (
            "edge_weight != 0 requires weight_forward and weight_backward")

    # --- tile choices ------------------------------------------------------
    # N tiling for adj contraction: single block for small N, 512-tiles otherwise
    # (512 is a multiple of 128 -> valid lane dim; keeps double-buffered bf16 adj
    #  tiles at ~2 MiB, well under the 64 MiB VMEM of v7x).
    n8 = _round_up(N, 8)
    if n8 <= 512:
        tile_n, n_pad = n8, n8
    else:
        tile_n, n_pad = 512, _round_up(N, 512)

    # M tiling for the projection stage (B*N folded into M).
    m = B * n_pad
    if m <= 256:
        tm, m_pad = m, m                 # m is already a multiple of 8
    else:
        tm, m_pad = 256, _round_up(m, 256)

    cdt = compute_dtype

    # --- weights: pad Fout -> Fp, fold edge_weight, concatenate, cast ------
    def pad_w(w):
        w = jnp.asarray(w, jnp.float32)
        return jnp.zeros((fin, fp), jnp.float32).at[:, :fout].set(w)

    if edge_weight != 0:
        w_cat = jnp.concatenate(
            [pad_w(weight),
             pad_w(edge_weight * jnp.asarray(weight_forward, jnp.float32)),
             pad_w(edge_weight * jnp.asarray(weight_backward, jnp.float32))],
            axis=1)
    else:
        w_cat = pad_w(weight)
    w_cat = w_cat.astype(cdt)

    # --- inputs: pad N, flatten B*N into M, cast ----------------------------
    x_pad = jnp.zeros((B, n_pad, fin), jnp.float32).at[:, :N, :].set(x)
    x_flat = x_pad.reshape(B * n_pad, fin)
    if m_pad != B * n_pad:
        x_flat = jnp.zeros((m_pad, fin), jnp.float32).at[:B * n_pad].set(x_flat)
    x_flat = x_flat.astype(cdt)

    # --- stage 1: one fused, lane-dense projection matmul -------------------
    s = _fused_projection(x_flat, w_cat, tm)             # (m_pad, G*Fp) f32
    s = s[:B * n_pad].reshape(B, n_pad, -1)

    if edge_weight == 0:
        # adj is never loaded in this path (no wasted HBM bandwidth / VMEM).
        return s[:, :N, :fout]

    s_loop = s[..., :fp]                                  # keep self-loop in f32
    s_f = s[..., fp:2 * fp].astype(cdt)
    s_b = s[..., 2 * fp:].astype(cdt)

    adj_pad = jnp.zeros((B, n_pad, n_pad), jnp.float32).at[:, :N, :N].set(
        jnp.asarray(adj, jnp.float32)).astype(cdt)

    out = _adj_contraction(adj_pad, s_loop, s_f, s_b, tile_n)
    return out[:, :N, :fout]


def xavier_uniform(key, shape, dtype=jnp.float32):
    fan_in, fan_out = shape
    limit = math.sqrt(6.0 / (fan_in + fan_out))
    return jax.random.uniform(key, shape, dtype=dtype, minval=-limit, maxval=limit)


if __name__ == "__main__":
    key = jax.random.PRNGKey(0)
    k_x, k_adj, k_w, k_wf, k_wb = jax.random.split(key, 5)

    B, N = 2, 8                     # batch, number of lane-cluster nodes
    in_features = 32
    out_features = 32
    edge_weight = 0.5

    x = jax.random.normal(k_x, (B, N, in_features), dtype=jnp.float32)
    adj = jax.random.uniform(k_adj, (B, N, N), dtype=jnp.float32)

    weight = xavier_uniform(k_w, (in_features, out_features))
    weight_forward = xavier_uniform(k_wf, (in_features, out_features))
    weight_backward = xavier_uniform(k_wb, (in_features, out_features))

    out = lclc_gnn_layer(x, adj, weight, weight_forward, weight_backward,
                         edge_weight=edge_weight)
    out = jax.block_until_ready(out)
    assert out.shape == (B, N, out_features)

    # Reference that replicates the kernel's mixed-precision pipeline
    # (bf16 operands, f32 accumulation, bf16 intermediates for the adj terms).
    cdt = jnp.bfloat16
    rnd = lambda a: a.astype(cdt).astype(jnp.float32)
    xr, adjr = rnd(x), rnd(adj)
    w0 = rnd(weight)
    wf = rnd(edge_weight * weight_forward)
    wb = rnd(edge_weight * weight_backward)
    s_loop = jnp.matmul(xr, w0)
    s_f = rnd(jnp.matmul(xr, wf))
    s_b = rnd(jnp.matmul(xr, wb))
    ref_mixed = (s_loop
                 + jnp.matmul(adjr, s_f)
                 + jnp.matmul(jnp.transpose(adjr, (0, 2, 1)), s_b))
    assert jnp.allclose(out, ref_mixed, atol=1e-3, rtol=1e-3), \
        "mismatch vs mixed-precision reference"

    # Loose sanity check against the pure-f32 module semantics.
    hi = jax.lax.Precision.HIGHEST
    ref_f32 = (jnp.matmul(x, weight, precision=hi)
               + edge_weight * jnp.matmul(
                   adj, jnp.matmul(x, weight_forward, precision=hi), precision=hi)
               + edge_weight * jnp.matmul(
                   jnp.transpose(adj, (0, 2, 1)),
                   jnp.matmul(x, weight_backward, precision=hi), precision=hi))
    assert jnp.allclose(out, ref_f32, atol=1e-1, rtol=1e-1), \
        "mixed-precision result too far from f32 reference"

    # Exercise the edge_weight == 0 path (adj never touched).
    out0 = lclc_gnn_layer(x, adj, weight, edge_weight=0.0)
    out0 = jax.block_until_ready(out0)
    assert jnp.allclose(out0, s_loop, atol=1e-3, rtol=1e-3), \
        "mismatch in edge_weight == 0 path"

    print("KERNEL_OK")
</pallas_src>

<mosaic_0001>
module attributes {stable_mosaic.version = 11 : i64} {
  func.func @_proj_kernel(%arg0: i32, %arg1: memref<16x32xbf16, #tpu.memory_space<vmem>>, %arg2: memref<32x384xbf16, #tpu.memory_space<vmem>>, %arg3: memref<16x384xf32, #tpu.memory_space<vmem>>) attributes {dimension_semantics = [#tpu.dimension_semantics<parallel>], iteration_bounds = array<i64: 1>, scalar_prefetch = 0 : i64, scratch_operands = 0 : i64, tpu.core_type = #tpu.core_type<tc>, window_params = [{transform_indices = @transform_0, window_bounds = array<i64: 16, 32>}, {pipeline_mode = #tpu.pipeline_mode<synchronous>, transform_indices = @transform_1, window_bounds = array<i64: 32, 384>}, {transform_indices = @transform_2, window_bounds = array<i64: 16, 384>}]} {
    %c0 = arith.constant 0 : index
    %c0_0 = arith.constant 0 : index
    %0 = vector.load %arg1[%c0, %c0_0] : memref<16x32xbf16, #tpu.memory_space<vmem>>, vector<16x32xbf16>
    %c0_1 = arith.constant 0 : index
    %c0_2 = arith.constant 0 : index
    %1 = vector.load %arg2[%c0_1, %c0_2] : memref<32x384xbf16, #tpu.memory_space<vmem>>, vector<32x384xbf16>
    %cst = arith.constant dense<0.000000e+00> : vector<16x384xf32>
    %2 = tpu.matmul %0, %1, %cst {dimension_numbers = #tpu.dot_dimension_numbers<[1], [0], [0], [1], [0, 0, 1, 1], [], []>} : vector<16x32xbf16>, vector<32x384xbf16>, vector<16x384xf32> -> vector<16x384xf32>
    %c0_3 = arith.constant 0 : index
    %c0_4 = arith.constant 0 : index
    %3 = vector.load %arg3[%c0_3, %c0_4] : memref<16x384xf32, #tpu.memory_space<vmem>>, vector<16x384xf32>
    tpu.vector_store %arg3[%c0_3, %c0_4], %2 {strides = array<i32>} : memref<16x384xf32, #tpu.memory_space<vmem>>, vector<16x384xf32>,
    return
  }
  func.func @transform_0(%arg0: i32) -> (i32, i32) {
    %c0_i32 = arith.constant 0 : i32
    %c0_i32_0 = arith.constant 0 : i32
    return %arg0, %c0_i32 : i32, i32
  }
  func.func @transform_1(%arg0: i32) -> (i32, i32) {
    %c0_i32 = arith.constant 0 : i32
    %c0_i32_0 = arith.constant 0 : i32
    %c0_i32_1 = arith.constant 0 : i32
    return %c0_i32, %c0_i32_0 : i32, i32
  }
  func.func @transform_2(%arg0: i32) -> (i32, i32) {
    %c0_i32 = arith.constant 0 : i32
    %c0_i32_0 = arith.constant 0 : i32
    return %arg0, %c0_i32 : i32, i32
  }
}

</mosaic_0001>

<bundles_post_ra>
// kernel: tpu_custom_call.1
= control target key start
LH: loop header
LB: loop body
LE: loop exit
PB: predicated region body
PF: predicated region fallthrough
CT: control target
= control target key end

     0   :  { %7 = vsyncpa [#allocation3], 0  ;;  %s376_s0 = inlined_call_operand.hbm [shape: bf16[16,32], index: 0, kind: input, shape index: {}]   ;;  %s377_s1 = inlined_call_operand.hbm [shape: bf16[32,384], index: 1, kind: input, shape index: {}]   ;;  %s378_s2 = inlined_call_operand.hbm [shape: f32[16,384], index: 2, kind: output, shape index: {}]  }
   0x1   :  { %8 = vsyncpa [#allocation6], 0 }
   0x2   :  { %9 = vsyncpa [#allocation4], 0  ;;  %s313_s9 = smov [#allocation2]   ;;  %s241_s13 = scalar_lea.hbm %s376_s0, 128 }
   0x3   :  { %s15_s10 = sshll.u32 %s313_s9, 4  ;;  %p242_p0 = scmp.ne.s32.totalorder %s376_s0, %s241_s13  ;;  %s16_s10 = int_to_ptr.vmem [resolvable:$true] %s15_s10 }
   0x4   :  { %p245_p1 = scmp.lt.u32.totalorder %s241_s13, %s376_s0 }
   0x6   :  { %p247_p2 = pnand %p245_p1, %p242_p0 }
   0x8   :  { %250 = shalt.err (!%p247_p2)
}
   0x9   :  { %s251_s18 = scalar_lea.vmem %s16_s10, 128  ;;  %p256_p4 = scmp.lt.s32.totalorder %s16_s10, %s16_s10 }
   0xa   :  { %p252_p3 = scmp.ne.s32.totalorder %s16_s10, %s251_s18  ;;  %p257_p5 = scmp.lt.s32.totalorder %s251_s18, %s251_s18 }
   0xc   :  { %p258_p6 = por %p257_p5, %p256_p4 }
   0xe   :  { %p259_p7 = pnand %p258_p6, %p252_p3 }
  0x10   :  { %262 = shalt.err (!%p259_p7)
}
  0x11   :  { %s314_s19 = smov 64   ;;  %s315_s20 = smov 4  }
  0x12   :  { %21 = dma.hbm_to_vmem [thread:$0]  %s376_s0, 128, %s16_s10, [#allocation3], %s314_s19, %s314_s19, %s315_s20  }
  0x13   :  { %s316_s23 = smov [#allocation5]   ;;  %s263_s27 = scalar_lea.hbm %s377_s1, 768 }
  0x14   :  { %s27_s24 = sshll.u32 %s316_s23, 4  ;;  %p264_p8 = scmp.ne.s32.totalorder %s377_s1, %s263_s27  ;;  %s28_s24 = int_to_ptr.vmem [resolvable:$true] %s27_s24 }
  0x15   :  { %p267_p9 = scmp.lt.u32.totalorder %s263_s27, %s377_s1 }
  0x17   :  { %p269_p10 = pnand %p267_p9, %p264_p8 }
  0x19   :  { %272 = shalt.err (!%p269_p10)
}
  0x1a   :  { %s273_s4 = scalar_lea.vmem %s28_s24, 768  ;;  %p278_p12 = scmp.lt.s32.totalorder %s28_s24, %s28_s24 }
  0x1b   :  { %p274_p11 = scmp.ne.s32.totalorder %s28_s24, %s273_s4  ;;  %p279_p13 = scmp.lt.s32.totalorder %s273_s4, %s273_s4 }
  0x1d   :  { %p280_p0 = por %p279_p13, %p278_p12 }
  0x1f   :  { %p281_p1 = pnand %p280_p0, %p274_p11 }
  0x21   :  { %284 = shalt.err (!%p281_p1)
}
  0x22   :  { %s317_s0 = smov 192   ;;  %s318_s5 = smov 12  }
  0x23   :  { %33 = dma.hbm_to_vmem [thread:$0]  %s377_s1, 768, %s28_s24, [#allocation6], %s317_s0, %s317_s0, %s318_s5  }
  0x24   :  { %307 = dma.done.wait [#allocation3], 128  }
  0x25   :  { %308 = vsyncadd [#allocation3], 4294967168 }
  0x26   :  { %309 = dma.done.wait [#allocation6], 768  }
  0x27   :  { %310 = vsyncadd [#allocation6], 4294966528  ;;  %v319_v0 = vmov 0.0   ;;  %vm320_vm0 = vmmov 0   ;;  %v321_v1 = vmov 0   ;;  %v240_v8 = vld [vmem:[#allocation2] sm:$0xff]  }
  0x28   :  { %212 = vmatprep.subr.bf16.mxu1 %v319_v0  ;;  %216 = vmatprep.mubr.msk.bf16.mxu1 %vm320_vm0, %v319_v0  ;;  %v232_v2 = vld [vmem:[#allocation5 + $0x4] ss:$12 sps:$4 sm:$0xff]   ;;  %v234_v3 = vld [vmem:[#allocation5 + $0x8] ss:$12 sps:$4 sm:$0xff]   ;;  %v235_v4 = vld [vmem:[#allocation5] ss:$12 sps:$4 sm:$0xff]  }
  0x29   :  { %124 = vmatprep.mubr.bf16.mxu0 %v321_v1  ;;  %92 = vmatprep.subr.bf16.mxu0 %v232_v2  ;;  %v236_v5 = vld [vmem:[#allocation5 + $0x1c] ss:$12 sps:$4 sm:$0xff]   ;;  %v238_v6 = vld [vmem:[#allocation5 + $0x20] ss:$12 sps:$4 sm:$0xff]   ;;  %v239_v7 = vld [vmem:[#allocation5 + $0x18] ss:$12 sps:$4 sm:$0xff]  }
  0x2a   :  { %213 = vmatpush3.bf16.msra.mxu1 %v234_v3  ;;  %93 = vmatpush1.bf16.msra.mxu0 %v235_v4  ;;  %vm88_vm1 = vcmask 261120   ;;  %s322_s1 = smov [#allocation7]  }
  0x2b   :  { %214 = vmatprep.subr.bf16.mxu1 %v319_v0  ;;  %94 = vmatprep.subr.bf16.mxu0 %v236_v5  ;;  %s187_s8 = sshll.u32 %s322_s1, 4  ;;  %s188_s8 = int_to_ptr.vmem [resolvable:$true] %s187_s8 }
  0x2c   :  { %s285_s9 = scalar_lea.vmem %s188_s8, 768  ;;  %p290_p3 = scmp.lt.s32.totalorder %s188_s8, %s188_s8 }
  0x2d   :  { %p286_p2 = scmp.ne.s32.totalorder %s188_s8, %s285_s9  ;;  %p291_p4 = scmp.lt.s32.totalorder %s285_s9, %s285_s9 }
  0x2e   :  { %215 = vmatpush3.bf16.msra.mxu1 %v238_v6  ;;  %95 = vmatpush1.bf16.msra.mxu0 %v239_v7 }
  0x2f   :  { %p292_p5 = por %p291_p4, %p290_p3 }
  0x31   :  { %217 = vmatmul.mubr.msk.bf16.vlgmr.msra.gmra.mrb[0].mxu1 %vm88_vm1, %v240_v8  ;;  %207 = vmatmul.mubr.msk.bf16.vlgmr.msra.gmra.mrb[0].mxu0 %vm88_vm1, %v240_v8  ;;  %p293_p6 = pnand %p292_p5, %p286_p2 }
 0x104   :  { %v169_v9 = vpop.f32.mrb[0].mxu1  ;;  %v126_v10 = vpop.f32.mrb[0].mxu0 }
 0x105   :  { %178 = vst [vmem:[#allocation7 + $0x10] sm:$0xff] %v169_v9  ;;  %v218_v11 = vpop.f32.mrb[1].mxu1  ;;  %176 = vst [vmem:[#allocation7] sm:$0xff] %v126_v10  ;;  %v128_v12 = vpop.f32.mrb[1].mxu0 }
 0x106   :  { %v172_v13 = vpop.f32.mrb[2].mxu1  ;;  %177 = vst [vmem:[#allocation7 + $0x8] sm:$0xff] %v128_v12  ;;  %v130_v14 = vpop.f32.mrb[2].mxu0 }
 0x107   :  { %181 = vst [vmem:[#allocation7 + $0x28] sm:$0xff] %v172_v13  ;;  %v219_v15 = vpop.f32.mrb[3].mxu1  ;;  %179 = vst [vmem:[#allocation7 + $0x18] sm:$0xff] %v130_v14  ;;  %v132_v16 = vpop.f32.mrb[3].mxu0 }
 0x108   :  { %180 = vst [vmem:[#allocation7 + $0x20] sm:$0xff] %v132_v16 }
 0x109   :  { %296 = shalt.err (!%p293_p6)
}
 0x10a   :  { %s297_s12 = scalar_lea.hbm %s378_s2, 768 }
 0x10b   :  { %p298_p7 = scmp.ne.s32.totalorder %s378_s2, %s297_s12  ;;  %p301_p8 = scmp.lt.u32.totalorder %s297_s12, %s378_s2 }
 0x10d   :  { %p303_p9 = pnand %p301_p8, %p298_p7 }
 0x10f   :  { %306 = shalt.err (!%p303_p9)
}
 0x110   :  { %s323_s17 = smov 384   ;;  %s324_s18 = smov 24  }
 0x111   :  { %193 = dma.vmem_to_hbm [thread:$0]  %s188_s8, 768, %s378_s2, [#allocation4], %s323_s17, %s323_s17, %s324_s18  }
 0x112   :  { %311 = dma.done.wait [#allocation4], 768  }
 0x113   :  { %312 = vsyncadd [#allocation4], 4294966528 }
 0x114   :  { %197 = vsyncpa [#allocation3], 1 }
 0x115   :  { %198 = vsyncpa [#allocation6], 1 }
 0x116   :  { %199 = vsyncpa [#allocation4], 1 }

</bundles_post_ra>
